<compile_context>
chip_gen: v6e
topology: v6e:2x2x1
jax: 0.10.0
libtpu: 0.0.40
codegen_flags: <defaults>
</compile_context>

<pallas_src>
import jax
import jax.numpy as jnp
from jax.experimental import pallas as pl
from jax.experimental.pallas import tpu as pltpu


def _dist_linear_kernel(x_ref, v_ref, rs_ref, cs_ref, o_ref):
    x = x_ref[...]                                    # (TM, K), storage dtype
    v = v_ref[...]                                    # (TN, K), storage dtype

    # Single-pass MXU feed: cast f32 operands to bf16 for the matmul only; the
    # accumulator and all normalization/scale math stay in f32.
    if x.dtype == jnp.float32:
        x = x.astype(jnp.bfloat16)
    if v.dtype == jnp.float32:
        v = v.astype(jnp.bfloat16)

    # Raw inner products on the MXU; contraction over dim 1 of both operands so the
    # (TN, K) weight tile is consumed exactly as stored (no transposed copy).
    raw = jax.lax.dot_general(
        x, v, dimension_numbers=(((1,), (1,)), ((), ())),
        preferred_element_type=jnp.float32)           # (TM, TN) f32

    # Rank-1 scales precomputed in the wrapper: (TM, 1) row scale, (1, TN) column scale.
    o_ref[...] = (raw * rs_ref[...] * cs_ref[...]).astype(o_ref.dtype)


def dist_linear(x, weight_v, weight_g, *, block_m=256, block_n=512):
    """Pallas implementation of distLinear.forward.

    x: (B, indim); weight_v: (outdim, indim); weight_g: (outdim, 1) or (outdim,).
    """
    B, indim = x.shape
    outdim = weight_v.shape[0]
    scale = 2.0 if outdim <= 200 else 10.0

    # ---- hoisted rank-1 scales (tiny XLA ops, done once per call) -----------------
    xf = x.astype(jnp.float32)
    x_norm = jnp.sqrt(jnp.sum(xf * xf, axis=1, keepdims=True))
    row_scale = (scale / (x_norm + 1e-5)).astype(jnp.float32)          # (B, 1)

    vf = weight_v.astype(jnp.float32)
    v_norm = jnp.sqrt(jnp.sum(vf * vf, axis=1))                        # (outdim,)
    # NOTE: WeightNorm has no epsilon here — an all-zero weight row yields inf/NaN,
    # matching the PyTorch semantics.
    col_scale = (weight_g.astype(jnp.float32).reshape(-1) / v_norm
                 ).reshape(1, outdim)                                  # (1, outdim)

    # ---- tile selection (VMEM-aware; re-derived for v7x's 64 MiB VMEM) ------------
    x_bytes = jnp.dtype(x.dtype).itemsize
    v_bytes = jnp.dtype(weight_v.dtype).itemsize
    o_bytes = x_bytes

    block_m = max(8, (int(block_m) // 8) * 8)
    block_n = max(128, (int(block_n) // 128) * 128)

    tm = B if B <= block_m else block_m
    tn = outdim if outdim <= block_n else block_n

    def vmem_estimate(tm_, tn_):
        # Double-buffered pipeline buffers + in-kernel bf16/f32 temporaries.
        buf = 2 * (tm_ * indim * x_bytes + tn_ * indim * v_bytes
                   + tm_ * tn_ * o_bytes + tm_ * 4 + tn_ * 4)
        tmp = (tm_ * indim + tn_ * indim) * 2 + tm_ * tn_ * 4
        return buf + tmp

    VMEM_BUDGET = 36 * 1024 * 1024
    while tn > 128 and vmem_estimate(tm, tn) > VMEM_BUDGET:
        tn_new = max(128, (((tn + 1) // 2) // 128) * 128)
        if tn_new == tn:
            break
        tn = tn_new
    while tm > 8 and vmem_estimate(tm, tn) > VMEM_BUDGET:
        tm_new = max(8, (((tm + 1) // 2) + 7) // 8 * 8)
        if tm_new == tm:
            break
        tm = tm_new

    vmem_limit = int(min(max(vmem_estimate(tm, tn) * 5 // 4, 32 * 1024 * 1024),
                         48 * 1024 * 1024))

    grid = (pl.cdiv(B, tm), pl.cdiv(outdim, tn))

    out = pl.pallas_call(
        _dist_linear_kernel,
        out_shape=jax.ShapeDtypeStruct((B, outdim), x.dtype),
        grid=grid,
        in_specs=[
            pl.BlockSpec((tm, indim), lambda i, j: (i, 0)),   # x rows (resident over j)
            pl.BlockSpec((tn, indim), lambda i, j: (j, 0)),   # weight_v rows (streamed)
            pl.BlockSpec((tm, 1), lambda i, j: (i, 0)),       # row scale
            pl.BlockSpec((1, tn), lambda i, j: (0, j)),       # column scale (lane-major)
        ],
        out_specs=pl.BlockSpec((tm, tn), lambda i, j: (i, j)),
        compiler_params=pltpu.CompilerParams(
            dimension_semantics=("parallel", "parallel"),
            vmem_limit_bytes=vmem_limit),
    )(x, weight_v, row_scale, col_scale)

    return out


def _reference(x, weight_v, weight_g):
    # Pure-JAX reference mirroring the PyTorch forward.
    outdim = weight_v.shape[0]
    scale_factor = 2.0 if outdim <= 200 else 10.0
    x_norm = jnp.linalg.norm(x, axis=1, keepdims=True)
    x_hat = x / (x_norm + 1e-5)
    v_norm = jnp.linalg.norm(weight_v, axis=1, keepdims=True)
    w_eff = weight_g.reshape(outdim, 1) * weight_v / v_norm
    return scale_factor * jnp.dot(x_hat, w_eff.T,
                                  precision=jax.lax.Precision.HIGHEST)


if __name__ == "__main__":
    # Test 1: small shapes, single-block path (full-array blocks).
    B, indim, outdim = 8, 32, 16
    kx, kv = jax.random.split(jax.random.PRNGKey(0))
    x = jax.random.normal(kx, (B, indim), dtype=jnp.float32)
    weight_v = 0.1 * jax.random.normal(kv, (outdim, indim), dtype=jnp.float32)
    # WeightNorm default init: g = ||v|| per output row, so W_eff == v initially.
    weight_g = jnp.linalg.norm(weight_v, axis=1, keepdims=True)

    out = jax.block_until_ready(dist_linear(x, weight_v, weight_g))
    ref = _reference(x, weight_v, weight_g)
    assert out.shape == (B, outdim)
    assert jnp.allclose(out, ref, atol=5e-2, rtol=5e-2), "mismatch vs reference (test 1)"

    # Test 2: multi-block grid, lane-dense 128-wide output tiles, non-trivial gain.
    B2, ind2, outd2 = 32, 128, 384
    k1, k2, k3 = jax.random.split(jax.random.PRNGKey(1), 3)
    x2 = jax.random.normal(k1, (B2, ind2), dtype=jnp.float32)
    v2 = 0.1 * jax.random.normal(k2, (outd2, ind2), dtype=jnp.float32)
    g2 = jax.random.uniform(k3, (outd2, 1), minval=0.5, maxval=2.0, dtype=jnp.float32)

    out2 = jax.block_until_ready(dist_linear(x2, v2, g2, block_m=16, block_n=128))
    ref2 = _reference(x2, v2, g2)
    assert out2.shape == (B2, outd2)
    assert jnp.allclose(out2, ref2, atol=5e-2, rtol=5e-2), "mismatch vs reference (test 2)"

    # Test 3: cdiv grid with partial last tiles (no host-side padding copies).
    B3, ind3, outd3 = 20, 64, 200
    k4, k5 = jax.random.split(jax.random.PRNGKey(2))
    x3 = jax.random.normal(k4, (B3, ind3), dtype=jnp.float32)
    v3 = 0.1 * jax.random.normal(k5, (outd3, ind3), dtype=jnp.float32)
    g3 = jnp.linalg.norm(v3, axis=1, keepdims=True)

    out3 = jax.block_until_ready(dist_linear(x3, v3, g3, block_m=16, block_n=128))
    ref3 = _reference(x3, v3, g3)
    assert out3.shape == (B3, outd3)
    assert jnp.allclose(out3, ref3, atol=5e-2, rtol=5e-2), "mismatch vs reference (test 3)"

    print("KERNEL_OK")
</pallas_src>

<mosaic_0001>
module attributes {stable_mosaic.version = 11 : i64} {
  func.func @_dist_linear_kernel(%arg0: i32, %arg1: i32, %arg2: memref<8x32xf32, #tpu.memory_space<vmem>>, %arg3: memref<16x32xf32, #tpu.memory_space<vmem>>, %arg4: memref<8x1xf32, #tpu.memory_space<vmem>>, %arg5: memref<1x16xf32, #tpu.memory_space<vmem>>, %arg6: memref<8x16xf32, #tpu.memory_space<vmem>>) attributes {dimension_semantics = [#tpu.dimension_semantics<parallel>, #tpu.dimension_semantics<parallel>], iteration_bounds = array<i64: 1, 1>, scalar_prefetch = 0 : i64, scratch_operands = 0 : i64, tpu.core_type = #tpu.core_type<tc>, window_params = [{transform_indices = @transform_0, window_bounds = array<i64: 8, 32>}, {transform_indices = @transform_1, window_bounds = array<i64: 16, 32>}, {transform_indices = @transform_2, window_bounds = array<i64: 8, 1>}, {transform_indices = @transform_3, window_bounds = array<i64: 1, 16>}, {transform_indices = @transform_4, window_bounds = array<i64: 8, 16>}]} {
    %c0 = arith.constant 0 : index
    %c0_0 = arith.constant 0 : index
    %0 = vector.load %arg2[%c0, %c0_0] : memref<8x32xf32, #tpu.memory_space<vmem>>, vector<8x32xf32>
    %c0_1 = arith.constant 0 : index
    %c0_2 = arith.constant 0 : index
    %1 = vector.load %arg3[%c0_1, %c0_2] : memref<16x32xf32, #tpu.memory_space<vmem>>, vector<16x32xf32>
    %2 = arith.truncf %0 : vector<8x32xf32> to vector<8x32xbf16>
    %3 = arith.truncf %1 : vector<16x32xf32> to vector<16x32xbf16>
    %cst = arith.constant dense<0.000000e+00> : vector<8x16xf32>
    %4 = tpu.matmul %2, %3, %cst {dimension_numbers = #tpu.dot_dimension_numbers<[1], [1], [0], [0], [0, 0, 1, 0], [], []>} : vector<8x32xbf16>, vector<16x32xbf16>, vector<8x16xf32> -> vector<8x16xf32>
    %c0_3 = arith.constant 0 : index
    %c0_4 = arith.constant 0 : index
    %5 = vector.load %arg4[%c0_3, %c0_4] : memref<8x1xf32, #tpu.memory_space<vmem>>, vector<8x1xf32>
    %6 = vector.broadcast %5 : vector<8x1xf32> to vector<8x16xf32>
    %7 = arith.mulf %4, %6 : vector<8x16xf32>
    %c0_5 = arith.constant 0 : index
    %c0_6 = arith.constant 0 : index
    %8 = vector.load %arg5[%c0_5, %c0_6] : memref<1x16xf32, #tpu.memory_space<vmem>>, vector<1x16xf32>
    %9 = vector.broadcast %8 : vector<1x16xf32> to vector<8x16xf32>
    %10 = arith.mulf %7, %9 : vector<8x16xf32>
    %c0_7 = arith.constant 0 : index
    %c0_8 = arith.constant 0 : index
    %11 = vector.load %arg6[%c0_7, %c0_8] : memref<8x16xf32, #tpu.memory_space<vmem>>, vector<8x16xf32>
    tpu.vector_store %arg6[%c0_7, %c0_8], %10 {strides = array<i32>} : memref<8x16xf32, #tpu.memory_space<vmem>>, vector<8x16xf32>,
    return
  }
  func.func @transform_0(%arg0: i32, %arg1: i32) -> (i32, i32) {
    %c0_i32 = arith.constant 0 : i32
    %c0_i32_0 = arith.constant 0 : i32
    return %arg0, %c0_i32 : i32, i32
  }
  func.func @transform_1(%arg0: i32, %arg1: i32) -> (i32, i32) {
    %c0_i32 = arith.constant 0 : i32
    %c0_i32_0 = arith.constant 0 : i32
    return %arg1, %c0_i32 : i32, i32
  }
  func.func @transform_2(%arg0: i32, %arg1: i32) -> (i32, i32) {
    %c0_i32 = arith.constant 0 : i32
    %c0_i32_0 = arith.constant 0 : i32
    return %arg0, %c0_i32 : i32, i32
  }
  func.func @transform_3(%arg0: i32, %arg1: i32) -> (i32, i32) {
    %c0_i32 = arith.constant 0 : i32
    %c0_i32_0 = arith.constant 0 : i32
    return %c0_i32, %arg1 : i32, i32
  }
  func.func @transform_4(%arg0: i32, %arg1: i32) -> (i32, i32) {
    %c0_i32 = arith.constant 0 : i32
    return %arg0, %arg1 : i32, i32
  }
}

</mosaic_0001>

<bundles_post_ra>
// kernel: tpu_custom_call.1
= control target key start
LH: loop header
LB: loop body
LE: loop exit
PB: predicated region body
PF: predicated region fallthrough
CT: control target
= control target key end

     0   :  { %9 = vsyncpa [#allocation3], 0  ;;  %s226_s0 = inlined_call_operand.vmem [shape: f32[8,32], index: 0, kind: input, shape index: {}]   ;;  %s227_s1 = inlined_call_operand.hbm [shape: f32[16,32], index: 1, kind: input, shape index: {}]   ;;  %s228_s2 = inlined_call_operand.vmem [shape: f32[8,1], index: 2, kind: input, shape index: {}]   ;;  %s229_s3 = inlined_call_operand.vmem [shape: f32[1,16], index: 3, kind: input, shape index: {}]   ;;  %s230_s4 = inlined_call_operand.hbm [shape: f32[8,16], index: 4, kind: output, shape index: {}]  }
   0x1   :  { %10 = vsyncpa [#allocation4], 0  ;;  %s179_s15 = smov [#allocation2]  }
   0x2   :  { %s18_s16 = sshll.u32 %s179_s15, 4  ;;  %s19_s16 = int_to_ptr.vmem [resolvable:$true] %s18_s16 }
   0x3   :  { %s143_s17 = scalar_lea.vmem %s19_s16, 256  ;;  %p148_p1 = scmp.lt.s32.totalorder %s19_s16, %s19_s16 }
   0x4   :  { %p144_p0 = scmp.ne.s32.totalorder %s19_s16, %s143_s17  ;;  %p149_p2 = scmp.lt.s32.totalorder %s143_s17, %s143_s17 }
   0x6   :  { %p150_p3 = por %p149_p2, %p148_p1 }
   0x8   :  { %p151_p4 = pnand %p150_p3, %p144_p0 }
   0xa   :  { %154 = shalt.err (!%p151_p4)
}
   0xb   :  { %s180_s18 = smov 128   ;;  %s181_s19 = smov 8  }
   0xc   :  { %24 = dma.hbm_to_vmem [thread:$0]  %s227_s1, 256, %s19_s16, [#allocation3], %s180_s18, %s180_s18, %s181_s19  }
   0xd   :  { %175 = dma.done.wait [#allocation3], 256  }
   0xe   :  { %176 = vsyncadd [#allocation3], 4294967040  ;;  %v182_v0 = vmov 0.0   ;;  %vm183_vm0 = vmmov 0   ;;  %v184_v1 = vmov 0   ;;  %v34_v2 = vld [vmem:[#allocation2] sm:$0xff] }
   0xf   :  { %121 = vmatprep.subr.bf16.mxu0 %v182_v0  ;;  %123 = vmatprep.mubr.msk.bf16.mxu0 %vm183_vm0, %v182_v0  ;;  %v35_v3 = vld [vmem:[#allocation2 + $0x8] sm:$0xff]  ;;  %vm38_vm1 = vcmask 261120   ;;  %v85_v5 = vld [vmem:[%s228_s2] sm:$0xff]  ;;  %s185_s27 = smov [#allocation5]   ;;  %vm100_vm2 = vcmask 130048  }
  0x10   :  { %134 = vset.pattern.permute.xlu0 %v184_v1  ;;  %v37_v4 = vpack.c.bf16 %v35_v3, %v34_v2  ;;  %v33_v7 = vld [vmem:[%s226_s0] sm:$0xff]  ;;  %s108_s28 = sshll.u32 %s185_s27, 4  ;;  %s109_s28 = int_to_ptr.vmem [resolvable:$true] %s108_s28 }
  0x11   :  { %88 = vperm.xlu0 %134, %v85_v5   ;;  %v36_v8 = vpack.c.bf16 %v33_v7, %v33_v7  ;;  %v118_v11 = vld [vmem:[%s229_s3] ss:$0 sm:$0xff]  ;;  %s155_s2 = scalar_lea.vmem %s109_s28, 128  ;;  %p160_p6 = scmp.lt.s32.totalorder %s109_s28, %s109_s28 }
  0x12   :  { %v43_v6 = vsel %vm38_vm1, %v37_v4, 0  ;;  %p156_p5 = scmp.ne.s32.totalorder %s109_s28, %s155_s2  ;;  %p161_p7 = scmp.lt.s32.totalorder %s155_s2, %s155_s2 }
  0x13   :  { %122 = vmatpush3.bf16.xpose.msra.mxu0 %v43_v6 }
  0x14   :  { %p162_p8 = por %p161_p7, %p160_p6 }
  0x16   :  { %p163_p9 = pnand %p162_p8, %p156_p5 }
  0x1a   :  { %124 = vmatmul.mubr.msk.bf16.vlgmr.msra.gmra.mxu0 %vm38_vm1, %v36_v8 }
  0x8c   :  { %v89_v9 = vpop.permute.xlu0 %88 }
  0xda   :  { %v79_v10 = vpop.f32.mrf.mxu0 }
  0xdb   :  { %v91_v12 = vmul.f32 %v89_v9, %v79_v10 }
  0xdc   :  { %v125_v13 = vpop.f32.mrf.mxu0 }
  0xdd   :  { %v99_v14 = vmul.f32 %v118_v11, %v91_v12 }
  0xde   :  { %v82_v15 = vpop.f32.mrf.mxu0 }
  0xdf   :  { %101 = vst.msk [vmem:[#allocation5] sm:$0xff] %vm100_vm2, %v99_v14 }
  0xe0   :  { %v126_v16 = vpop.f32.mrf.mxu0 }
  0xe1   :  { %166 = shalt.err (!%p163_p9)
}
  0xe2   :  { %111 = dma.vmem_to_hbm [thread:$0]  %s109_s28, 128, %s230_s4, [#allocation4]  }
  0xe3   :  { %177 = dma.done.wait [#allocation4], 128  }
  0xe4   :  { %178 = vsyncadd [#allocation4], 4294967168 }
  0xe5   :  { %115 = vsyncpa [#allocation3], 1 }
  0xe6   :  { %116 = vsyncpa [#allocation4], 1 }

</bundles_post_ra>
